<compile_context>
chip_gen: v5e
topology: v5e:2x2
jax: 0.10.0
libtpu: 0.0.40
codegen_flags: <defaults>
</compile_context>

<pallas_src>
import numpy as np

import jax
import jax.numpy as jnp
from jax.experimental import pallas as pl
from jax.experimental.pallas import tpu as pltpu


def encoder_pool_kernel(x_ref, m_ref, o_ref):
    # x_ref: (BB, C, H*W) f32 feature block
    # m_ref: (BB, S*S, H*W) bf16 pooling matrix (VMEM-resident, same every step)
    # o_ref: (BB, S*S, C) f32 pooled, channels-last output block
    x = x_ref[...].astype(jnp.bfloat16)                      # VPU cast, hidden under DMA
    o_ref[...] = jnp.einsum('bok,bck->boc', m_ref[...], x,
                            preferred_element_type=jnp.float32)


def _pool_matrix(in_size, out_size):
    """(out_size, in_size) adaptive-average-pooling operator (PyTorch bin formula)."""
    m = np.zeros((out_size, in_size), dtype=np.float32)
    for i in range(out_size):
        lo = (i * in_size) // out_size
        hi = -(-((i + 1) * in_size) // out_size)
        m[i, lo:hi] = 1.0 / (hi - lo)
    return m


def encoder_pool_pallas(features, *, encoded_image_size=14, block_b=8):
    """features: (B, C, H, W) f32 backbone feature map -> (B, S, S, C) f32."""
    B, C, H, W = features.shape
    S = encoded_image_size
    HW, SS = H * W, S * S

    # Batch block: BB examples per grid step (amortizes per-step overhead, fills MXU).
    BB = max(1, min(block_b, B))
    n_blocks = -(-B // BB)
    B_pad = n_blocks * BB
    if B_pad != B:
        features = jnp.pad(features, ((0, B_pad - B), (0, 0), (0, 0), (0, 0)))

    x = features.reshape(B_pad, C, HW)                       # row-major view, free

    # M[(i,j), (h,w)] = 1/(count_i * count_j) if (h, w) falls in output bin (i, j).
    m2d = np.kron(_pool_matrix(H, S), _pool_matrix(W, S))    # (SS, HW) f32
    m = jnp.broadcast_to(jnp.asarray(m2d, dtype=jnp.bfloat16), (BB, SS, HW))

    out = pl.pallas_call(
        encoder_pool_kernel,
        out_shape=jax.ShapeDtypeStruct((B_pad, SS, C), jnp.float32),
        grid_spec=pltpu.PrefetchScalarGridSpec(
            num_scalar_prefetch=0,
            grid=(n_blocks,),
            in_specs=[
                pl.BlockSpec((BB, C, HW), lambda b: (b, 0, 0)),    # feature block (streams)
                pl.BlockSpec((BB, SS, HW), lambda b: (0, 0, 0)),   # pooling matrix (resident)
            ],
            out_specs=pl.BlockSpec((BB, SS, C), lambda b: (b, 0, 0)),
        ),
        compiler_params=pltpu.CompilerParams(
            dimension_semantics=("parallel",)),
    )(x, m)

    return out[:B].reshape(B, S, S, C)


def encoder_pool_reference(features, encoded_image_size):
    """Pure-JAX f32 reference: AdaptiveAvgPool2d((S, S)) followed by permute(0,2,3,1)."""
    B, C, H, W = features.shape
    S = encoded_image_size
    rows = []
    for i in range(S):
        h0 = (i * H) // S
        h1 = -(-((i + 1) * H) // S)
        cols = []
        for j in range(S):
            w0 = (j * W) // S
            w1 = -(-((j + 1) * W) // S)
            cols.append(features[:, :, h0:h1, w0:w1].mean(axis=(2, 3)))   # (B, C)
        rows.append(jnp.stack(cols, axis=-1))                             # (B, C, S)
    pooled = jnp.stack(rows, axis=-2)                                     # (B, C, S, S)
    return pooled.transpose(0, 2, 3, 1)                                   # (B, S, S, C)


if __name__ == "__main__":
    # Small stand-in for the ResNet-101 feature map (real model: (B, 2048, h/32, w/32)).
    # The pretrained backbone itself is untranslatable here (see TODO above).
    B, C, H, W = 4, 128, 16, 16
    S = 14                                # encoded_image_size, module default

    key = jax.random.PRNGKey(0)
    features = jax.random.normal(key, (B, C, H, W), jnp.float32)

    out = encoder_pool_pallas(features, encoded_image_size=S, block_b=2)
    jax.block_until_ready(out)

    ref = encoder_pool_reference(features, S)
    assert out.shape == (B, S, S, C)
    # bf16 MXU operands with f32 accumulation -> slightly loosened tolerance vs pure f32.
    assert jnp.allclose(out, ref, atol=2e-2, rtol=2e-2)

    print("KERNEL_OK")
</pallas_src>

<mosaic_0001>
module attributes {stable_mosaic.version = 11 : i64} {
  func.func @encoder_pool_kernel(%arg0: i32, %arg1: memref<2x128x256xf32, #tpu.memory_space<vmem>>, %arg2: memref<2x196x256xbf16, #tpu.memory_space<vmem>>, %arg3: memref<2x196x128xf32, #tpu.memory_space<vmem>>) attributes {dimension_semantics = [#tpu.dimension_semantics<parallel>], iteration_bounds = array<i64: 2>, scalar_prefetch = 0 : i64, scratch_operands = 0 : i64, tpu.core_type = #tpu.core_type<tc>, window_params = [{transform_indices = @transform_0, window_bounds = array<i64: 2, 128, 256>}, {pipeline_mode = #tpu.pipeline_mode<synchronous>, transform_indices = @transform_1, window_bounds = array<i64: 2, 196, 256>}, {transform_indices = @transform_2, window_bounds = array<i64: 2, 196, 128>}]} {
    %c0 = arith.constant 0 : index
    %c0_0 = arith.constant 0 : index
    %c0_1 = arith.constant 0 : index
    %0 = vector.load %arg1[%c0, %c0_0, %c0_1] : memref<2x128x256xf32, #tpu.memory_space<vmem>>, vector<2x128x256xf32>
    %1 = arith.truncf %0 : vector<2x128x256xf32> to vector<2x128x256xbf16>
    %c0_2 = arith.constant 0 : index
    %c0_3 = arith.constant 0 : index
    %c0_4 = arith.constant 0 : index
    %2 = vector.load %arg2[%c0_2, %c0_3, %c0_4] : memref<2x196x256xbf16, #tpu.memory_space<vmem>>, vector<2x196x256xbf16>
    "tpu.trace_start"() <{level = 10 : i32, message = "bok,bck->boc"}> : () -> ()
    %cst = arith.constant dense<0.000000e+00> : vector<2x196x128xf32>
    %3 = tpu.matmul %2, %1, %cst {dimension_numbers = #tpu.dot_dimension_numbers<[2], [2], [1], [1], [0, 0, 0, 1, 1, 1], [0], [0]>} : vector<2x196x256xbf16>, vector<2x128x256xbf16>, vector<2x196x128xf32> -> vector<2x196x128xf32>
    "tpu.trace_stop"() : () -> ()
    %c0_5 = arith.constant 0 : index
    %c0_6 = arith.constant 0 : index
    %c0_7 = arith.constant 0 : index
    %4 = vector.load %arg3[%c0_5, %c0_6, %c0_7] : memref<2x196x128xf32, #tpu.memory_space<vmem>>, vector<2x196x128xf32>
    tpu.vector_store %arg3[%c0_5, %c0_6, %c0_7], %3 {strides = array<i32>} : memref<2x196x128xf32, #tpu.memory_space<vmem>>, vector<2x196x128xf32>,
    return
  }
  func.func @transform_0(%arg0: i32) -> (i32, i32, i32) {
    %c0_i32 = arith.constant 0 : i32
    %c0_i32_0 = arith.constant 0 : i32
    %c0_i32_1 = arith.constant 0 : i32
    return %arg0, %c0_i32, %c0_i32_0 : i32, i32, i32
  }
  func.func @transform_1(%arg0: i32) -> (i32, i32, i32) {
    %c0_i32 = arith.constant 0 : i32
    %c0_i32_0 = arith.constant 0 : i32
    %c0_i32_1 = arith.constant 0 : i32
    %c0_i32_2 = arith.constant 0 : i32
    return %c0_i32, %c0_i32_0, %c0_i32_1 : i32, i32, i32
  }
  func.func @transform_2(%arg0: i32) -> (i32, i32, i32) {
    %c0_i32 = arith.constant 0 : i32
    %c0_i32_0 = arith.constant 0 : i32
    %c0_i32_1 = arith.constant 0 : i32
    return %arg0, %c0_i32, %c0_i32_0 : i32, i32, i32
  }
}

</mosaic_0001>

<bundles_post_ra>
// kernel: tpu_custom_call.1
= control target key start
LH: loop header
LB: loop body
LE: loop exit
PB: predicated region body
PF: predicated region fallthrough
CT: control target
= control target key end

     0   :  { %7 = vsyncpa [#allocation3], 0  ;;  %s2026_s0 = inlined_call_operand.hbm [shape: f32[4,128,256], index: 0, kind: input, shape index: {}]   ;;  %s2027_s1 = inlined_call_operand.vmem [shape: bf16[2,196,256], index: 1, kind: input, shape index: {}]   ;;  %s2028_s2 = inlined_call_operand.vmem [shape: f32[4,196,128], index: 2, kind: output, shape index: {}]  }
   0x1   :  { %9 = vsyncpa [#allocation3 + $0x1], 0  ;;  %s1523_s9 = smov 0   ;;  %s1525_s10 = smov 0  }
   0x2   :  { %s1527_s11 = smov 0   ;;  %s1529_s12 = smov 0  }
   0x3 LB: > { %s1142_s13 = sadd.s32 4294967295, %s1504_s12   ;;  %s1543_s14 = sadd.s32 1, %s1504_s12   ;;  %s1504_s12 = sphi %s1529_s12, %s2035_s12   ;;  %s1500_s11 = sphi %s1527_s11, %s2034_s11   ;;  %s1496_s10 = sphi %s1525_s10, %s2033_s10   ;;  %s1492_s9 = sphi %s1523_s9, %s2032_s9  }
   0x4   : > { %s19_s15 = ssub.s32 %s1504_s12, %s1543_s14  ;;  %s22_s16 = sadd.s32 1, %s1500_s11 }
   0x5   : > { %p20_p0 = scmp.eq.s32.totalorder %s19_s15, 0  ;;  %p29_p1 = scmp.ne.s32.totalorder %s1500_s11, %s1496_s10 }
   0x6   : > { %p30_p2 = scmp.eq.s32.totalorder %s1504_s12, 0  ;;  %p35_p3 = scmp.ne.s32.totalorder %s1496_s10, %s1492_s9 }
   0x7   : > { %s1553_s17 = scalar_select %p20_p0, %s1500_s11, %s22_s16  }
   0x8   : > { %p1555_p4 = por %p30_p2, %p29_p1  ;;  %p36_p5 = scmp.eq.s32.totalorder %s1142_s13, 0 }
   0x9   : > { %p1405_p6 = scmp.lt.s32.totalorder %s1504_s12, 2  ;;  %s109_s20 = sand.u32 1, %s1500_s11  }
   0xa   : > { %p1562_p7 = por %p36_p5, %p35_p3  ;;  %s1146_s21 = sshll.u32 %s109_s20, 9 }
   0xb   : > { %s1349_s22 = sshll.u32 %s1504_s12, 9  ;;  %s113_s26 = scalar_lea.vmem [#allocation2], %s1146_s21 }
   0xc   : > { %s119_s25 = scalar_lea.hbm %s2026_s0, %s1349_s22  ;;  %s122_s27 = sshll.u32 %s113_s26, 4  ;;  %s123_s27 = int_to_ptr.vmem [resolvable:$true] %s122_s27 }
   0xd   : > { %s120_s28 = sshll.u32 %s119_s25, 4  ;;  %p1573_p8 = pnand %p1405_p6, %p1555_p4  ;;  %s121_s28 = int_to_ptr.hbm [resolvable:$true] %s120_s28 }
   0xe   : > { %p1150_p9 = scmp.ge.s32.totalorder %s1504_s12, 1  ;;  %s110_s30 = scalar_lea.sflag [#allocation3], %s109_s20 }
   0xf   : > { %s1440_s3 = sshra.s32 %s121_s28, 4  ;;  %p1444_p11 = pneg %p1573_p8  ;;  %s1441_s3 = int_to_ptr.hbm [resolvable:$true] %s1440_s3 }
  0x10   : > { %s1442_s4 = scalar_lea.hbm %s1441_s3, 512  ;;  %s1447_s7 = scalar_lea.hbm %s2026_s0, 1024 }
  0x11   : > { %p1443_p10 = scmp.ne.s32.totalorder %s1441_s3, %s1442_s4  ;;  %p1448_p0 = scmp.lt.s32.totalorder %s1441_s3, %s2026_s0 }
  0x12   : > { %p1449_p1 = scmp.lt.s32.totalorder %s1447_s7, %s1442_s4 }
  0x13   : > { %p1445_p12 = pnand %p1444_p11, %p1443_p10 }
  0x14   : > { %p1450_p2 = por %p1449_p1, %p1448_p0 }
  0x15   : > { %p1446_p13 = pneg %p1445_p12 }
  0x17   : > { %p1451_p3 = pnand %p1450_p2, %p1446_p13 }
  0x19   : > { %1454 = shalt.err (!%p1451_p3)
}
  0x1a   : > { %s1506_s15 = smov 256   ;;  %s1507_s16 = smov 16  }
  0x1b   : > { %1404 = dma.hbm_to_vmem [thread:$0]  (!%p1573_p8), %s121_s28, 8192, %s123_s27, %s110_s30, %s1506_s15, %s1506_s15, %s1507_s16  }
  0x1c   : > { %p130_p4 = scmp.lt.s32.totalorder %s1504_s12, 3 }
  0x1e   : > { %p131_p5 = pnand %p1150_p9, %p130_p4 }
  0x1f   : > { %s136_s18 = sand.u32 (!%p131_p5), 1, %s1496_s10  }
  0x20   : > { %134 = sbr.rel (%p131_p5) target bundleno = 442 (0x1ba), region = 28  ;;  %s1151_s20 = sshll.u32 (!%p131_p5), %s136_s18, 9 }
  0x21   : > { %s137_s21 = scalar_lea.sflag (!%p131_p5), [#allocation3], %s136_s18  ;;  %s1592_s22 = scalar_lea.vmem (!%p131_p5), [#allocation2], %s1151_s20 }
  0x25   : > { %1487 = dma.done.wait (%p1562_p7), %s137_s21, 8192  }
  0x26   : > { %1489 = vsyncadd (%p1562_p7), %s137_s21, 4294959104  ;;  %v199_v0 = vld [vmem:[%s1592_s22 + $0xe0] sm:$0xff]  ;;  %v200_v1 = vld [vmem:[%s1592_s22 + $0xe8] sm:$0xff]  ;;  %s1152_s18 = sshll.u32 %s1142_s13, 1 }
  0x27   : > { %v201_v2 = vld [vmem:[%s1592_s22 + $0xf0] sm:$0xff]  ;;  %v202_v3 = vld [vmem:[%s1592_s22 + $0xf8] sm:$0xff]  ;;  %v249_v4 = vpack.c.bf16 %v200_v1, %v199_v0  ;;  %v231_v5 = vld [vmem:[%s1592_s22 + $0x1e0] sm:$0xff]  ;;  %p165_p6 = scmp.lt.s32.totalorder %s1152_s18, 3 }
  0x28   : > { %v232_v6 = vld [vmem:[%s1592_s22 + $0x1e8] sm:$0xff]  ;;  %v250_v7 = vpack.c.bf16 %v202_v3, %v201_v2  ;;  %v233_v8 = vld [vmem:[%s1592_s22 + $0x1f0] sm:$0xff]  ;;  %v234_v9 = vld [vmem:[%s1592_s22 + $0x1f8] sm:$0xff] }
  0x29   : > { %v265_v10 = vpack.c.bf16 %v232_v6, %v231_v5  ;;  %v195_v11 = vld [vmem:[%s1592_s22 + $0xc0] sm:$0xff]  ;;  %v488_v12 = vunpack.c.l.b16 %v249_v4  ;;  %v489_v13 = vunpack.c.h.b16 %v249_v4  ;;  %v266_v14 = vpack.c.bf16 %v234_v9, %v233_v8  ;;  %v196_v15 = vld [vmem:[%s1592_s22 + $0xc8] sm:$0xff]  ;;  %v197_v16 = vld [vmem:[%s1592_s22 + $0xd0] sm:$0xff]  ;;  %s2037_s18 = smov (!%p165_p6, %s1152_s18), 3 }
  0x2a   : > { %v198_v17 = vld [vmem:[%s1592_s22 + $0xd8] sm:$0xff]  ;;  %v490_v18 = vunpack.c.l.b16 %v250_v7  ;;  %v491_v19 = vunpack.c.h.b16 %v250_v7  ;;  %v227_v22 = vld [vmem:[%s1592_s22 + $0x1c0] sm:$0xff]  ;;  %v228_v23 = vld [vmem:[%s1592_s22 + $0x1c8] sm:$0xff]  ;;  %v247_v27 = vpack.c.bf16 %v196_v15, %v195_v11  ;;  %s1398_s20 = smul.u32 200, %s2037_s18 }
  0x2b   : > { %v841_v20 = vunpack.c.l.b16 %v265_v10  ;;  %v842_v21 = vunpack.c.h.b16 %v265_v10  ;;  %v229_v24 = vld [vmem:[%s1592_s22 + $0x1d0] sm:$0xff]  ;;  %v843_v25 = vunpack.c.l.b16 %v266_v14  ;;  %v844_v26 = vunpack.c.h.b16 %v266_v14  ;;  %v230_v29 = vld [vmem:[%s1592_s22 + $0x1d8] sm:$0xff]  ;;  %v191_v40 = vld [vmem:[%s1592_s22 + $0xa0] sm:$0xff] }
  0x2c   : > { %v248_v28 = vpack.c.bf16 %v198_v17, %v197_v16  ;;  %v506_v30 = vpack.c.b16 %v490_v18, %v488_v12  ;;  %v507_v31 = vpack.c.b16 %v491_v19, %v489_v13  ;;  %v263_v32 = vpack.c.bf16 %v228_v23, %v227_v22  ;;  %v192_v41 = vld [vmem:[%s1592_s22 + $0xa8] sm:$0xff]  ;;  %v193_v46 = vld [vmem:[%s1592_s22 + $0xb0] sm:$0xff]  ;;  %v194_v47 = vld [vmem:[%s1592_s22 + $0xb8] sm:$0xff]  ;;  %s1883_s8 = scalar_lea.vmem %s2028_s2, %s1398_s20 }
  0x2d   : > { %v264_v33 = vpack.c.bf16 %v230_v29, %v229_v24  ;;  %v859_v34 = vpack.c.b16 %v843_v25, %v841_v20  ;;  %v860_v35 = vpack.c.b16 %v844_v26, %v842_v21  ;;  %v484_v36 = vunpack.c.l.b16 %v247_v27  ;;  %v223_v48 = vld [vmem:[%s1592_s22 + $0x1a0] sm:$0xff]  ;;  %v224_v49 = vld [vmem:[%s1592_s22 + $0x1a8] sm:$0xff]  ;;  %v225_v50 = vld [vmem:[%s1592_s22 + $0x1b0] sm:$0xff] }
  0x2e   : > { %524 = vmatpush.bf16.xpose.msra.mxu0 %v506_v30  ;;  %597 = vmatpush.bf16.xpose.msra.mxu1 %v507_v31  ;;  %v486_v37 = vunpack.c.l.b16 %v248_v28  ;;  %v485_v38 = vunpack.c.h.b16 %v247_v27  ;;  %v487_v39 = vunpack.c.h.b16 %v248_v28  ;;  %v837_v42 = vunpack.c.l.b16 %v263_v32  ;;  %v226_v51 = vld [vmem:[%s1592_s22 + $0x1b8] sm:$0xff]  ;;  %v187_v0 = vld [vmem:[%s1592_s22 + $0x80] sm:$0xff]  ;;  %v188_v1 = vld [vmem:[%s1592_s22 + $0x88] sm:$0xff] }
  0x2f   : > { %877 = vmatpush.bf16.xpose.msra.mxu2 %v859_v34  ;;  %950 = vmatpush.bf16.xpose.msra.mxu3 %v860_v35  ;;  %v839_v43 = vunpack.c.l.b16 %v264_v33  ;;  %v838_v44 = vunpack.c.h.b16 %v263_v32  ;;  %v840_v45 = vunpack.c.h.b16 %v264_v33  ;;  %v245_v54 = vpack.c.bf16 %v192_v41, %v191_v40  ;;  %v189_v6 = vld [vmem:[%s1592_s22 + $0x90] sm:$0xff]  ;;  %v190_v7 = vld [vmem:[%s1592_s22 + $0x98] sm:$0xff]  ;;  %v219_v8 = vld [vmem:[%s1592_s22 + $0x180] sm:$0xff] }
  0x30   : > { %v504_v52 = vpack.c.b16 %v486_v37, %v484_v36  ;;  %v505_v53 = vpack.c.b16 %v487_v39, %v485_v38  ;;  %v246_v55 = vpack.c.bf16 %v194_v47, %v193_v46  ;;  %v261_v58 = vpack.c.bf16 %v224_v49, %v223_v48  ;;  %v220_v9 = vld [vmem:[%s1592_s22 + $0x188] sm:$0xff]  ;;  %v221_v10 = vld [vmem:[%s1592_s22 + $0x190] sm:$0xff]  ;;  %v222_v11 = vld [vmem:[%s1592_s22 + $0x198] sm:$0xff] }
  0x31   : > { %v857_v56 = vpack.c.b16 %v839_v43, %v837_v42  ;;  %v858_v57 = vpack.c.b16 %v840_v45, %v838_v44  ;;  %v262_v59 = vpack.c.bf16 %v226_v51, %v225_v50  ;;  %v480_v60 = vunpack.c.l.b16 %v245_v54  ;;  %v183_v24 = vld [vmem:[%s1592_s22 + $0x60] sm:$0xff]  ;;  %v184_v25 = vld [vmem:[%s1592_s22 + $0x68] sm:$0xff]  ;;  %v185_v30 = vld [vmem:[%s1592_s22 + $0x70] sm:$0xff] }
  0x32   : > { %v482_v61 = vunpack.c.l.b16 %v246_v55  ;;  %v481_v62 = vunpack.c.h.b16 %v245_v54  ;;  %v483_v63 = vunpack.c.h.b16 %v246_v55  ;;  %v833_v2 = vunpack.c.l.b16 %v261_v58  ;;  %v186_v31 = vld [vmem:[%s1592_s22 + $0x78] sm:$0xff]  ;;  %v215_v32 = vld [vmem:[%s1592_s22 + $0x160] sm:$0xff]  ;;  %v216_v33 = vld [vmem:[%s1592_s22 + $0x168] sm:$0xff] }
  0x33   : > { %v835_v3 = vunpack.c.l.b16 %v262_v59  ;;  %v834_v4 = vunpack.c.h.b16 %v261_v58  ;;  %v836_v5 = vunpack.c.h.b16 %v262_v59  ;;  %v243_v14 = vpack.c.bf16 %v188_v1, %v187_v0  ;;  %v217_v34 = vld [vmem:[%s1592_s22 + $0x170] sm:$0xff]  ;;  %v218_v35 = vld [vmem:[%s1592_s22 + $0x178] sm:$0xff]  ;;  %v179_v48 = vld [vmem:[%s1592_s22 + $0x40] sm:$0xff] }
  0x34   : > { %v502_v12 = vpack.c.b16 %v482_v61, %v480_v60  ;;  %v503_v13 = vpack.c.b16 %v483_v63, %v481_v62  ;;  %v244_v15 = vpack.c.bf16 %v190_v7, %v189_v6  ;;  %v259_v18 = vpack.c.bf16 %v220_v9, %v219_v8  ;;  %v180_v49 = vld [vmem:[%s1592_s22 + $0x48] sm:$0xff]  ;;  %v181_v54 = vld [vmem:[%s1592_s22 + $0x50] sm:$0xff]  ;;  %v182_v55 = vld [vmem:[%s1592_s22 + $0x58] sm:$0xff] }
  0x35   : > { %v855_v16 = vpack.c.b16 %v835_v3, %v833_v2  ;;  %v856_v17 = vpack.c.b16 %v836_v5, %v834_v4  ;;  %v260_v19 = vpack.c.bf16 %v222_v11, %v221_v10  ;;  %v476_v20 = vunpack.c.l.b16 %v243_v14  ;;  %v213_v58 = vld [vmem:[%s1592_s22 + $0x150] sm:$0xff]  ;;  %v214_v59 = vld [vmem:[%s1592_s22 + $0x158] sm:$0xff]  ;;  %v175_v8 = vld [vmem:[%s1592_s22 + $0x20] sm:$0xff] }
  0x36   : > { %525 = vmatpush.bf16.xpose.msra.mxu0 %v504_v52  ;;  %598 = vmatpush.bf16.xpose.msra.mxu1 %v505_v53  ;;  %v478_v21 = vunpack.c.l.b16 %v244_v15  ;;  %v477_v22 = vunpack.c.h.b16 %v243_v14  ;;  %v479_v23 = vunpack.c.h.b16 %v244_v15  ;;  %v829_v26 = vunpack.c.l.b16 %v259_v18  ;;  %v176_v9 = vld [vmem:[%s1592_s22 + $0x28] sm:$0xff]  ;;  %v177_v14 = vld [vmem:[%s1592_s22 + $0x30] sm:$0xff]  ;;  %v178_v15 = vld [vmem:[%s1592_s22 + $0x38] sm:$0xff] }
  0x37   : > { %878 = vmatpush.bf16.xpose.msra.mxu2 %v857_v56  ;;  %951 = vmatpush.bf16.xpose.msra.mxu3 %v858_v57  ;;  %v831_v27 = vunpack.c.l.b16 %v260_v19  ;;  %v830_v28 = vunpack.c.h.b16 %v259_v18  ;;  %v832_v29 = vunpack.c.h.b16 %v260_v19  ;;  %v241_v38 = vpack.c.bf16 %v184_v25, %v183_v24  ;;  %v211_v56 = vld [vmem:[%s1592_s22 + $0x140] sm:$0xff]  ;;  %v212_v57 = vld [vmem:[%s1592_s22 + $0x148] sm:$0xff]  ;;  %v209_v18 = vld [vmem:[%s1592_s22 + $0x130] sm:$0xff] }
  0x38   : > { %v500_v36 = vpack.c.b16 %v478_v21, %v476_v20  ;;  %v501_v37 = vpack.c.b16 %v479_v23, %v477_v22  ;;  %v242_v39 = vpack.c.bf16 %v186_v31, %v185_v30  ;;  %v257_v42 = vpack.c.bf16 %v216_v33, %v215_v32  ;;  %v210_v19 = vld [vmem:[%s1592_s22 + $0x138] sm:$0xff]  ;;  %v171_v32 = vld [vmem:[%s1592_s22] sm:$0xff]  ;;  %v172_v33 = vld [vmem:[%s1592_s22 + $0x8] sm:$0xff] }
  0x39   : > { %v853_v40 = vpack.c.b16 %v831_v27, %v829_v26  ;;  %v854_v41 = vpack.c.b16 %v832_v29, %v830_v28  ;;  %v258_v43 = vpack.c.bf16 %v218_v35, %v217_v34  ;;  %v472_v44 = vunpack.c.l.b16 %v241_v38 }
  0x3a   : > { %v474_v45 = vunpack.c.l.b16 %v242_v39  ;;  %v473_v46 = vunpack.c.h.b16 %v241_v38  ;;  %v475_v47 = vunpack.c.h.b16 %v242_v39  ;;  %v825_v50 = vunpack.c.l.b16 %v257_v42  ;;  %v173_v38 = vld [vmem:[%s1592_s22 + $0x10] sm:$0xff]  ;;  %v174_v39 = vld [vmem:[%s1592_s22 + $0x18] sm:$0xff] }
  0x3b   : > { %v827_v51 = vunpack.c.l.b16 %v258_v43  ;;  %v826_v52 = vunpack.c.h.b16 %v257_v42  ;;  %v828_v53 = vunpack.c.h.b16 %v258_v43  ;;  %v239_v62 = vpack.c.bf16 %v180_v49, %v179_v48  ;;  %v205_v42 = vld [vmem:[%s1592_s22 + $0x110] sm:$0xff]  ;;  %v206_v43 = vld [vmem:[%s1592_s22 + $0x118] sm:$0xff] }
  0x3c   : > { %v498_v60 = vpack.c.b16 %v474_v45, %v472_v44  ;;  %v499_v61 = vpack.c.b16 %v475_v47, %v473_v46  ;;  %v240_v63 = vpack.c.bf16 %v182_v55, %v181_v54  ;;  %v255_v2 = vpack.c.bf16 %v212_v57, %v211_v56 }
  0x3d   : > { %v851_v0 = vpack.c.b16 %v827_v51, %v825_v50  ;;  %v852_v1 = vpack.c.b16 %v828_v53, %v826_v52  ;;  %v256_v3 = vpack.c.bf16 %v214_v59, %v213_v58  ;;  %v468_v4 = vunpack.c.l.b16 %v239_v62 }
  0x3e   : > { %526 = vmatpush.bf16.xpose.msra.mxu0 %v502_v12  ;;  %599 = vmatpush.bf16.xpose.msra.mxu1 %v503_v13  ;;  %v470_v5 = vunpack.c.l.b16 %v240_v63  ;;  %v469_v6 = vunpack.c.h.b16 %v239_v62  ;;  %v471_v7 = vunpack.c.h.b16 %v240_v63  ;;  %v821_v10 = vunpack.c.l.b16 %v255_v2 }
  0x3f   : > { %879 = vmatpush.bf16.xpose.msra.mxu2 %v855_v16  ;;  %952 = vmatpush.bf16.xpose.msra.mxu3 %v856_v17  ;;  %v823_v11 = vunpack.c.l.b16 %v256_v3  ;;  %v822_v12 = vunpack.c.h.b16 %v255_v2  ;;  %v824_v13 = vunpack.c.h.b16 %v256_v3  ;;  %v207_v16 = vld [vmem:[%s1592_s22 + $0x120] sm:$0xff]  ;;  %v208_v17 = vld [vmem:[%s1592_s22 + $0x128] sm:$0xff]  ;;  %v237_v22 = vpack.c.bf16 %v176_v9, %v175_v8 }
  0x40   : > { %v496_v20 = vpack.c.b16 %v470_v5, %v468_v4  ;;  %v497_v21 = vpack.c.b16 %v471_v7, %v469_v6  ;;  %v238_v23 = vpack.c.bf16 %v178_v15, %v177_v14  ;;  %v253_v26 = vpack.c.bf16 %v208_v17, %v207_v16  ;;  %v1350_v2 = vld [vmem:[%s2027_s1 + $0x4] sm:$0xf]  ;;  %v1158_v3 = vld [vmem:[%s2027_s1 + $0x8] sm:$0xf0]  ;;  %v1252_v4 = vld [vmem:[%s2027_s1 + $0xc8] sm:$0xf] }
  0x41   : > { %v849_v24 = vpack.c.b16 %v823_v11, %v821_v10  ;;  %v850_v25 = vpack.c.b16 %v824_v13, %v822_v12  ;;  %v254_v27 = vpack.c.bf16 %v210_v19, %v209_v18  ;;  %v464_v28 = vunpack.c.l.b16 %v237_v22  ;;  %v1375_v5 = vld [vmem:[%s2027_s1 + $0xcc] sm:$0xf0]  ;;  %v1374_v6 = vld [vmem:[%s2027_s1 + $0xcc] sm:$0xf]  ;;  %v1254_v7 = vld [vmem:[%s2027_s1 + $0xd0] sm:$0xf0] }
  0x42   : > { %v466_v29 = vunpack.c.l.b16 %v238_v23  ;;  %v465_v30 = vunpack.c.h.b16 %v237_v22  ;;  %v467_v31 = vunpack.c.h.b16 %v238_v23  ;;  %v817_v34 = vunpack.c.l.b16 %v253_v26  ;;  %v1164_v12 = vld [vmem:[%s2027_s1 + $0x10] sm:$0xf]  ;;  %v1353_v13 = vld [vmem:[%s2027_s1 + $0x14] sm:$0xf0]  ;;  %v1352_v14 = vld [vmem:[%s2027_s1 + $0x14] sm:$0xf] }
  0x43   : > { %v819_v35 = vunpack.c.l.b16 %v254_v27  ;;  %v235_v46 = vpack.c.bf16 %v172_v33, %v171_v32  ;;  %v236_v47 = vpack.c.bf16 %v174_v39, %v173_v38  ;;  %v252_v51 = vpack.c.bf16 %v206_v43, %v205_v42  ;;  %v1166_v15 = vld [vmem:[%s2027_s1 + $0x18] sm:$0xf0]  ;;  %v1260_v16 = vld [vmem:[%s2027_s1 + $0xd8] sm:$0xf]  ;;  %v1377_v17 = vld [vmem:[%s2027_s1 + $0xdc] sm:$0xf0] }
  0x44   : > { %v494_v44 = vpack.c.b16 %v466_v29, %v464_v28  ;;  %v495_v45 = vpack.c.b16 %v467_v31, %v465_v30  ;;  %v1161_v9 = vor.u32 %v1350_v2, %v1158_v3  ;;  %v1253_v10 = vor.u32 %v1375_v5, %v1252_v4  ;;  %v1376_v18 = vld [vmem:[%s2027_s1 + $0xdc] sm:$0xf]  ;;  %v1262_v19 = vld [vmem:[%s2027_s1 + $0xe0] sm:$0xf0]  ;;  %v1268_v28 = vld [vmem:[%s2027_s1 + $0xe8] sm:$0xf] }
  0x45   : > { %v847_v48 = vpack.c.b16 %v819_v35, %v817_v34  ;;  %v460_v52 = vunpack.c.l.b16 %v235_v46  ;;  %v462_v53 = vunpack.c.l.b16 %v236_v47  ;;  %v461_v54 = vunpack.c.h.b16 %v235_v46  ;;  %v1379_v29 = vld [vmem:[%s2027_s1 + $0xec] sm:$0xf0]  ;;  %v1378_v30 = vld [vmem:[%s2027_s1 + $0xec] sm:$0xf]  ;;  %v1270_v31 = vld [vmem:[%s2027_s1 + $0xf0] sm:$0xf0] }
  0x46   : > { %527 = vmatpush.bf16.xpose.msra.mxu0 %v500_v36  ;;  %600 = vmatpush.bf16.xpose.msra.mxu1 %v501_v37  ;;  %v818_v36 = vunpack.c.h.b16 %v253_v26  ;;  %v820_v37 = vunpack.c.h.b16 %v254_v27  ;;  %v463_v55 = vunpack.c.h.b16 %v236_v47  ;;  %v815_v57 = vunpack.c.l.b16 %v252_v51  ;;  %v1354_v26 = vld [vmem:[%s2027_s1 + $0x24] sm:$0xf]  ;;  %v1174_v27 = vld [vmem:[%s2027_s1 + $0x28] sm:$0xf0]  ;;  %v1356_v38 = vld [vmem:[%s2027_s1 + $0x34] sm:$0xf] }
  0x47   : > { %880 = vmatpush.bf16.xpose.msra.mxu2 %v853_v40  ;;  %953 = vmatpush.bf16.xpose.msra.mxu3 %v854_v41  ;;  %v203_v40 = vld [vmem:[%s1592_s22 + $0x100] sm:$0xff]  ;;  %v204_v41 = vld [vmem:[%s1592_s22 + $0x108] sm:$0xff]  ;;  %v816_v59 = vunpack.c.h.b16 %v252_v51  ;;  %v1257_v11 = vor.u32 %v1374_v6, %v1254_v7  ;;  %v1261_v22 = vor.u32 %v1377_v17, %v1260_v16  ;;  %v1265_v23 = vor.u32 %v1376_v18, %v1262_v19  ;;  %v1182_v39 = vld [vmem:[%s2027_s1 + $0x38] sm:$0xf0] }
  0x48   : > { %v848_v49 = vpack.c.b16 %v820_v37, %v818_v36  ;;  %v251_v50 = vpack.c.bf16 %v204_v41, %v203_v40  ;;  %v1177_v33 = vor.u32 %v1354_v26, %v1174_v27  ;;  %v1269_v34 = vor.u32 %v1379_v29, %v1268_v28  ;;  %v1180_v36 = vld [vmem:[%s2027_s1 + $0x30] sm:$0xf]  ;;  %v1357_v37 = vld [vmem:[%s2027_s1 + $0x34] sm:$0xf0]  ;;  %v1381_v41 = vld [vmem:[%s2027_s1 + $0xfc] sm:$0xf0] }
  0x49   : > { %v1273_v35 = vor.u32 %v1378_v30, %v1270_v31  ;;  %v1276_v40 = vld [vmem:[%s2027_s1 + $0xf8] sm:$0xf]  ;;  %v1380_v42 = vld [vmem:[%s2027_s1 + $0xfc] sm:$0xf]  ;;  %v1278_v43 = vld [vmem:[%s2027_s1 + $0x100] sm:$0xf0] }
  0x4a   : > { %v813_v56 = vunpack.c.l.b16 %v251_v50  ;;  %v814_v58 = vunpack.c.h.b16 %v251_v50  ;;  %v1277_v46 = vor.u32 %v1381_v41, %v1276_v40  ;;  %v1281_v47 = vor.u32 %v1380_v42, %v1278_v43  ;;  %v1358_v50 = vld [vmem:[%s2027_s1 + $0x44] sm:$0xf]  ;;  %v1190_v51 = vld [vmem:[%s2027_s1 + $0x48] sm:$0xf0]  ;;  %v1384_v2 = vld [vmem:[%s2027_s1 + $0x11c] sm:$0xf] }
  0x4b   : > { %v1294_v3 = vld [vmem:[%s2027_s1 + $0x120] sm:$0xf0]  ;;  %v1388_v26 = vld [vmem:[%s2027_s1 + $0x13c] sm:$0xf] }
  0x4c   : > { %v845_v62 = vpack.c.b16 %v815_v57, %v813_v56  ;;  %v846_v63 = vpack.c.b16 %v816_v59, %v814_v58  ;;  %v1193_v57 = vor.u32 %v1358_v50, %v1190_v51  ;;  %v1297_v7 = vor.u32 %v1384_v2, %v1294_v3  ;;  %v1310_v27 = vld [vmem:[%s2027_s1 + $0x140] sm:$0xf0] }
  0x4d   : > { %v1313_v31 = vor.u32 %v1388_v26, %v1310_v27 }
  0x4e   : > { %528 = vmatpush.bf16.xpose.msra.mxu0 %v498_v60  ;;  %601 = vmatpush.bf16.xpose.msra.mxu1 %v499_v61  ;;  %v492_v60 = vpack.c.b16 %v462_v53, %v460_v52  ;;  %v493_v61 = vpack.c.b16 %v463_v55, %v461_v54  ;;  %v1284_v52 = vld [vmem:[%s2027_s1 + $0x108] sm:$0xf]  ;;  %v1383_v53 = vld [vmem:[%s2027_s1 + $0x10c] sm:$0xf0]  ;;  %v1382_v54 = vld [vmem:[%s2027_s1 + $0x10c] sm:$0xf] }
  0x4f   : > { %881 = vmatpush.bf16.xpose.msra.mxu2 %v851_v0  ;;  %954 = vmatpush.bf16.xpose.msra.mxu3 %v852_v1  ;;  %v1156_v0 = vld [vmem:[%s2027_s1] sm:$0xf]  ;;  %v1351_v1 = vld [vmem:[%s2027_s1 + $0x4] sm:$0xf0]  ;;  %v1286_v55 = vld [vmem:[%s2027_s1 + $0x110] sm:$0xf0]  ;;  %v1285_v58 = vor.u32 %v1383_v53, %v1284_v52 }
  0x50   : > { %v1157_v8 = vor.u32 %v1351_v1, %v1156_v0  ;;  %v1289_v59 = vor.u32 %v1382_v54, %v1286_v55  ;;  %v1292_v0 = vld [vmem:[%s2027_s1 + $0x118] sm:$0xf]  ;;  %v1385_v1 = vld [vmem:[%s2027_s1 + $0x11c] sm:$0xf0]  ;;  %v1228_v53 = vld [vmem:[%s2027_s1 + $0x90] sm:$0xf] }
  0x51   : > { %v1293_v6 = vor.u32 %v1385_v1, %v1292_v0  ;;  %v1369_v54 = vld [vmem:[%s2027_s1 + $0x94] sm:$0xf0]  ;;  %v1368_v55 = vld [vmem:[%s2027_s1 + $0x94] sm:$0xf] }
  0x56   : > { %529 = vmatpush.bf16.xpose.msra.mxu0 %v496_v20  ;;  %602 = vmatpush.bf16.xpose.msra.mxu1 %v497_v21  ;;  %v1165_v20 = vor.u32 %v1353_v13, %v1164_v12  ;;  %v1169_v21 = vor.u32 %v1352_v14, %v1166_v15  ;;  %v1300_v12 = vld [vmem:[%s2027_s1 + $0x128] sm:$0xf]  ;;  %v1387_v13 = vld [vmem:[%s2027_s1 + $0x12c] sm:$0xf0]  ;;  %v1386_v14 = vld [vmem:[%s2027_s1 + $0x12c] sm:$0xf] }
  0x57   : > { %882 = vmatpush.bf16.xpose.msra.mxu2 %v849_v24  ;;  %955 = vmatpush.bf16.xpose.msra.mxu3 %v850_v25  ;;  %v1172_v24 = vld [vmem:[%s2027_s1 + $0x20] sm:$0xf]  ;;  %v1355_v25 = vld [vmem:[%s2027_s1 + $0x24] sm:$0xf0]  ;;  %v1302_v15 = vld [vmem:[%s2027_s1 + $0x130] sm:$0xf0]  ;;  %v1301_v18 = vor.u32 %v1387_v13, %v1300_v12 }
  0x58   : > { %v1173_v32 = vor.u32 %v1355_v25, %v1172_v24  ;;  %v1305_v19 = vor.u32 %v1386_v14, %v1302_v15  ;;  %v1308_v24 = vld [vmem:[%s2027_s1 + $0x138] sm:$0xf]  ;;  %v1389_v25 = vld [vmem:[%s2027_s1 + $0x13c] sm:$0xf0]  ;;  %v1371_v14 = vld [vmem:[%s2027_s1 + $0xa4] sm:$0xf0] }
  0x59   : > { %v1309_v30 = vor.u32 %v1389_v25, %v1308_v24  ;;  %v1236_v13 = vld [vmem:[%s2027_s1 + $0xa0] sm:$0xf]  ;;  %v1370_v15 = vld [vmem:[%s2027_s1 + $0xa4] sm:$0xf] }
  0x5e   : > { %530 = vmatpush.bf16.xpose.msra.mxu0 %v494_v44  ;;  %603 = vmatpush.bf16.xpose.msra.mxu1 %v495_v45  ;;  %v1181_v44 = vor.u32 %v1357_v37, %v1180_v36  ;;  %v1185_v45 = vor.u32 %v1356_v38, %v1182_v39  ;;  %v1316_v36 = vld [vmem:[%s2027_s1 + $0x148] sm:$0xf]  ;;  %v1391_v37 = vld [vmem:[%s2027_s1 + $0x14c] sm:$0xf0]  ;;  %v1390_v38 = vld [vmem:[%s2027_s1 + $0x14c] sm:$0xf] }
  0x5f   : > { %883 = vmatpush.bf16.xpose.msra.mxu2 %v847_v48  ;;  %956 = vmatpush.bf16.xpose.msra.mxu3 %v848_v49  ;;  %v1188_v48 = vld [vmem:[%s2027_s1 + $0x40] sm:$0xf]  ;;  %v1359_v49 = vld [vmem:[%s2027_s1 + $0x44] sm:$0xf0]  ;;  %v1318_v39 = vld [vmem:[%s2027_s1 + $0x150] sm:$0xf0] }
  0x60   : > { %v1189_v56 = vor.u32 %v1359_v49, %v1188_v48 }
  0x66   : > { %531 = vmatpush.bf16.xpose.msra.mxu0 %v492_v60  ;;  %604 = vmatpush.bf16.xpose.msra.mxu1 %v493_v61  ;;  %v1196_v60 = vld [vmem:[%s2027_s1 + $0x50] sm:$0xf]  ;;  %v1361_v61 = vld [vmem:[%s2027_s1 + $0x54] sm:$0xf0] }
  0x67   : > { %884 = vmatpush.bf16.xpose.msra.mxu2 %v845_v62  ;;  %957 = vmatpush.bf16.xpose.msra.mxu3 %v846_v63  ;;  %v1360_v62 = vld [vmem:[%s2027_s1 + $0x54] sm:$0xf]  ;;  %v1198_v63 = vld [vmem:[%s2027_s1 + $0x58] sm:$0xf0]  ;;  %v1197_v4 = vor.u32 %v1361_v61, %v1196_v60  ;;  %v1326_v60 = vld [vmem:[%s2027_s1 + $0x160] sm:$0xf0] }
  0x68   : > { %v1201_v5 = vor.u32 %v1360_v62, %v1198_v63  ;;  %v1229_v63 = vor.u32 %v1369_v54, %v1228_v53 }
  0x6d   : > { %532 = vmatmul.bf16.vlgmr.msra.gmra.mxu0 %v1157_v8  ;;  %605 = vmatmul.bf16.vlgmr.msra.gmra.mxu1 %v1161_v9  ;;  %v1204_v8 = vld [vmem:[%s2027_s1 + $0x60] sm:$0xf]  ;;  %v1363_v9 = vld [vmem:[%s2027_s1 + $0x64] sm:$0xf0] }
  0x6e   : > { %885 = vmatmul.bf16.vlgmr.msra.gmra.mxu2 %v1253_v10  ;;  %958 = vmatmul.bf16.vlgmr.msra.gmra.mxu3 %v1257_v11  ;;  %v1362_v10 = vld [vmem:[%s2027_s1 + $0x64] sm:$0xf]  ;;  %v1206_v11 = vld [vmem:[%s2027_s1 + $0x68] sm:$0xf0]  ;;  %v1205_v16 = vor.u32 %v1363_v9, %v1204_v8 }
  0x6f   : > { %v1209_v17 = vor.u32 %v1362_v10, %v1206_v11 }
  0x7d   : > { %537 = vmatmul.bf16.gmra.mxu0 %v1165_v20  ;;  %610 = vmatmul.bf16.gmra.mxu1 %v1169_v21  ;;  %v1212_v20 = vld [vmem:[%s2027_s1 + $0x70] sm:$0xf]  ;;  %v1365_v21 = vld [vmem:[%s2027_s1 + $0x74] sm:$0xf0] }
  0x7e   : > { %890 = vmatmul.bf16.gmra.mxu2 %v1261_v22  ;;  %963 = vmatmul.bf16.gmra.mxu3 %v1265_v23  ;;  %v1364_v22 = vld [vmem:[%s2027_s1 + $0x74] sm:$0xf]  ;;  %v1214_v23 = vld [vmem:[%s2027_s1 + $0x78] sm:$0xf0]  ;;  %v1213_v28 = vor.u32 %v1365_v21, %v1212_v20 }
  0x7f   : > { %v1217_v29 = vor.u32 %v1364_v22, %v1214_v23  ;;  %v1334_v20 = vld [vmem:[%s2027_s1 + $0x170] sm:$0xf0]  ;;  %v1237_v23 = vor.u32 %v1371_v14, %v1236_v13 }
  0x8d   : > { %542 = vmatmul.bf16.gmra.mxu0 %v1173_v32  ;;  %615 = vmatmul.bf16.gmra.mxu1 %v1177_v33  ;;  %v1220_v32 = vld [vmem:[%s2027_s1 + $0x80] sm:$0xf]  ;;  %v1367_v33 = vld [vmem:[%s2027_s1 + $0x84] sm:$0xf0] }
  0x8e   : > { %895 = vmatmul.bf16.gmra.mxu2 %v1269_v34  ;;  %968 = vmatmul.bf16.gmra.mxu3 %v1273_v35  ;;  %v1366_v34 = vld [vmem:[%s2027_s1 + $0x84] sm:$0xf]  ;;  %v1222_v35 = vld [vmem:[%s2027_s1 + $0x88] sm:$0xf0]  ;;  %v1221_v40 = vor.u32 %v1367_v33, %v1220_v32 }
  0x8f   : > { %v1225_v41 = vor.u32 %v1366_v34, %v1222_v35 }
  0x9d   : > { %547 = vmatmul.bf16.gmra.mxu0 %v1181_v44  ;;  %620 = vmatmul.bf16.gmra.mxu1 %v1185_v45  ;;  %v1317_v44 = vor.u32 %v1391_v37, %v1316_v36  ;;  %v1321_v45 = vor.u32 %v1390_v38, %v1318_v39  ;;  %v1244_v37 = vld [vmem:[%s2027_s1 + $0xb0] sm:$0xf]  ;;  %v1373_v38 = vld [vmem:[%s2027_s1 + $0xb4] sm:$0xf0]  ;;  %v1372_v39 = vld [vmem:[%s2027_s1 + $0xb4] sm:$0xf] }
  0x9e   : > { %900 = vmatmul.bf16.gmra.mxu2 %v1277_v46  ;;  %973 = vmatmul.bf16.gmra.mxu3 %v1281_v47 }
  0xad   : > { %552 = vmatmul.bf16.gmra.mxu0 %v1189_v56  ;;  %625 = vmatmul.bf16.gmra.mxu1 %v1193_v57  ;;  %v1230_v56 = vld [vmem:[%s2027_s1 + $0x98] sm:$0xf0]  ;;  %v1324_v57 = vld [vmem:[%s2027_s1 + $0x158] sm:$0xf] }
  0xae   : > { %905 = vmatmul.bf16.gmra.mxu2 %v1285_v58  ;;  %978 = vmatmul.bf16.gmra.mxu3 %v1289_v59  ;;  %v1393_v58 = vld [vmem:[%s2027_s1 + $0x15c] sm:$0xf0]  ;;  %v1392_v59 = vld [vmem:[%s2027_s1 + $0x15c] sm:$0xf]  ;;  %v1233_v0 = vor.u32 %v1368_v55, %v1230_v56 }
  0xbd   : > { %557 = vmatmul.bf16.gmra.mxu0 %v1197_v4  ;;  %630 = vmatmul.bf16.gmra.mxu1 %v1201_v5  ;;  %v1325_v4 = vor.u32 %v1393_v58, %v1324_v57  ;;  %v1329_v5 = vor.u32 %v1392_v59, %v1326_v60  ;;  %v291_v60 = vld [vmem:[%s2027_s1 + $0xc0] sm:$0x33] }
  0xbe   : > { %910 = vmatmul.bf16.gmra.mxu2 %v1293_v6  ;;  %983 = vmatmul.bf16.gmra.mxu3 %v1297_v7 }
  0xcd   : > { %562 = vmatmul.bf16.gmra.mxu0 %v1205_v16  ;;  %635 = vmatmul.bf16.gmra.mxu1 %v1209_v17  ;;  %v1238_v16 = vld [vmem:[%s2027_s1 + $0xa8] sm:$0xf0]  ;;  %v1332_v17 = vld [vmem:[%s2027_s1 + $0x168] sm:$0xf] }
  0xce   : > { %915 = vmatmul.bf16.gmra.mxu2 %v1301_v18  ;;  %988 = vmatmul.bf16.gmra.mxu3 %v1305_v19  ;;  %v1395_v18 = vld [vmem:[%s2027_s1 + $0x16c] sm:$0xf0]  ;;  %v1394_v19 = vld [vmem:[%s2027_s1 + $0x16c] sm:$0xf]  ;;  %v1241_v24 = vor.u32 %v1370_v15, %v1238_v16 }
  0xdd   : > { %567 = vmatmul.bf16.gmra.mxu0 %v1213_v28  ;;  %640 = vmatmul.bf16.gmra.mxu1 %v1217_v29  ;;  %v1333_v28 = vor.u32 %v1395_v18, %v1332_v17  ;;  %v1337_v29 = vor.u32 %v1394_v19, %v1334_v20 }
  0xde   : > { %920 = vmatmul.bf16.gmra.mxu2 %v1309_v30  ;;  %993 = vmatmul.bf16.gmra.mxu3 %v1313_v31 }
  0xea   : > { %v533_v42 = vpop.f32.mrf.mxu0  ;;  %v606_v43 = vpop.f32.mrf.mxu1 }
  0xeb   : > { %v607_v46 = vadd.f32 %v606_v43, %v533_v42  ;;  %v1397_v42 = vld [vmem:[%s2027_s1 + $0x17c] sm:$0xf0]  ;;  %v1396_v43 = vld [vmem:[%s2027_s1 + $0x17c] sm:$0xf] }
  0xed   : > { %1023 = vst [vmem:[%s1883_s8] sm:$0xff] %v607_v46  ;;  %572 = vmatmul.bf16.gmra.mxu0 %v1221_v40  ;;  %645 = vmatmul.bf16.gmra.mxu1 %v1225_v41  ;;  %v1246_v40 = vld [vmem:[%s2027_s1 + $0xb8] sm:$0xf0]  ;;  %v1340_v41 = vld [vmem:[%s2027_s1 + $0x178] sm:$0xf] }
  0xee   : > { %925 = vmatmul.bf16.gmra.mxu2 %v1317_v44  ;;  %998 = vmatmul.bf16.gmra.mxu3 %v1321_v45  ;;  %v1342_v44 = vld [vmem:[%s2027_s1 + $0x180] sm:$0xf0] }
  0xef   : > { %v1345_v53 = vor.u32 %v1396_v43, %v1342_v44 }
  0xf1   : > { %v886_v47 = vpop.f32.mrf.mxu2  ;;  %v959_v48 = vpop.f32.mrf.mxu3 }
  0xf2   : > { %v960_v49 = vadd.f32 %v959_v48, %v886_v47  ;;  %v535_v50 = vpop.f32.mrf.mxu0  ;;  %v608_v51 = vpop.f32.mrf.mxu1  ;;  %v1245_v47 = vor.u32 %v1373_v38, %v1244_v37  ;;  %v1249_v48 = vor.u32 %v1372_v39, %v1246_v40 }
  0xf3   : > { %v609_v52 = vadd.f32 %v608_v51, %v535_v50 }
  0xf4   : > { %1048 = vst [vmem:[%s1883_s8 + $0xc8] sm:$0xff] %v960_v49 }
  0xf5   : > { %1024 = vst [vmem:[%s1883_s8 + $0x8] sm:$0xff] %v609_v52  ;;  %v1341_v52 = vor.u32 %v1397_v42, %v1340_v41 }
  0xf9   : > { %v888_v61 = vpop.f32.mrf.mxu2  ;;  %v961_v62 = vpop.f32.mrf.mxu3 }
  0xfa   : > { %v962_v1 = vadd.f32 %v961_v62, %v888_v61  ;;  %v538_v2 = vpop.f32.mrf.mxu0  ;;  %v611_v3 = vpop.f32.mrf.mxu1  ;;  %v316_v62 = vld [vmem:[%s2027_s1 + $0x188] sm:$0x33] }
  0xfb   : > { %v612_v6 = vadd.f32 %v611_v3, %v538_v2  ;;  %v744_v2 = vunpack.c.h.b16 %v316_v62 }
  0xfc   : > { %1049 = vst [vmem:[%s1883_s8 + $0xd0] sm:$0xff] %v962_v1  ;;  %v743_v1 = vunpack.c.l.b16 %v316_v62 }
  0xfd   : > { %1025 = vst [vmem:[%s1883_s8 + $0x10] sm:$0xff] %v612_v6  ;;  %577 = vmatmul.bf16.gmra.mxu0 %v1229_v63  ;;  %650 = vmatmul.bf16.gmra.mxu1 %v1233_v0  ;;  %v390_v63 = vunpack.c.l.b16 %v291_v60  ;;  %v391_v0 = vunpack.c.h.b16 %v291_v60 }
  0xfe   : > { %930 = vmatmul.bf16.gmra.mxu2 %v1325_v4  ;;  %1003 = vmatmul.bf16.gmra.mxu3 %v1329_v5 }
  0xff   : > { %v416_v5 = vpack.c.b16 %v390_v63, %v390_v63  ;;  %v417_v6 = vpack.c.b16 %v391_v0, %v391_v0 }
 0x101   : > { %v891_v7 = vpop.f32.mrf.mxu2  ;;  %v964_v8 = vpop.f32.mrf.mxu3 }
 0x102   : > { %v965_v9 = vadd.f32 %v964_v8, %v891_v7  ;;  %v540_v10 = vpop.f32.mrf.mxu0  ;;  %v613_v11 = vpop.f32.mrf.mxu1 }
 0x103   : > { %v614_v12 = vadd.f32 %v613_v11, %v540_v10  ;;  %v769_v10 = vpack.c.b16 %v743_v1, %v743_v1  ;;  %v770_v11 = vpack.c.b16 %v744_v2, %v744_v2 }
 0x104   : > { %1050 = vst [vmem:[%s1883_s8 + $0xd8] sm:$0xff] %v965_v9 }
 0x105   : > { %1026 = vst [vmem:[%s1883_s8 + $0x18] sm:$0xff] %v614_v12 }
 0x109   : > { %v893_v21 = vpop.f32.mrf.mxu2  ;;  %v966_v22 = vpop.f32.mrf.mxu3 }
 0x10a   : > { %v967_v25 = vadd.f32 %v966_v22, %v893_v21  ;;  %v543_v26 = vpop.f32.mrf.mxu0  ;;  %v616_v27 = vpop.f32.mrf.mxu1 }
 0x10b   : > { %v617_v30 = vadd.f32 %v616_v27, %v543_v26 }
 0x10c   : > { %1051 = vst [vmem:[%s1883_s8 + $0xe0] sm:$0xff] %v967_v25 }
 0x10d   : > { %1027 = vst [vmem:[%s1883_s8 + $0x20] sm:$0xff] %v617_v30  ;;  %582 = vmatmul.bf16.gmra.mxu0 %v1237_v23  ;;  %655 = vmatmul.bf16.gmra.mxu1 %v1241_v24 }
 0x10e   : > { %935 = vmatmul.bf16.gmra.mxu2 %v1333_v28  ;;  %1008 = vmatmul.bf16.gmra.mxu3 %v1337_v29 }
 0x111   : > { %v896_v31 = vpop.f32.mrf.mxu2  ;;  %v969_v32 = vpop.f32.mrf.mxu3 }
 0x112   : > { %v970_v33 = vadd.f32 %v969_v32, %v896_v31  ;;  %v545_v34 = vpop.f32.mrf.mxu0  ;;  %v618_v35 = vpop.f32.mrf.mxu1 }
 0x113   : > { %v619_v36 = vadd.f32 %v618_v35, %v545_v34 }
 0x114   : > { %1052 = vst [vmem:[%s1883_s8 + $0xe8] sm:$0xff] %v970_v33 }
 0x115   : > { %1028 = vst [vmem:[%s1883_s8 + $0x28] sm:$0xff] %v619_v36 }
 0x119   : > { %v898_v45 = vpop.f32.mrf.mxu2  ;;  %v971_v46 = vpop.f32.mrf.mxu3 }
 0x11a   : > { %v972_v49 = vadd.f32 %v971_v46, %v898_v45  ;;  %v548_v50 = vpop.f32.mrf.mxu0  ;;  %v621_v51 = vpop.f32.mrf.mxu1 }
 0x11b   : > { %v622_v54 = vadd.f32 %v621_v51, %v548_v50 }
 0x11c   : > { %1053 = vst [vmem:[%s1883_s8 + $0xf0] sm:$0xff] %v972_v49 }
 0x11d   : > { %1029 = vst [vmem:[%s1883_s8 + $0x30] sm:$0xff] %v622_v54  ;;  %587 = vmatmul.bf16.gmra.mxu0 %v1245_v47  ;;  %660 = vmatmul.bf16.gmra.mxu1 %v1249_v48 }
 0x11e   : > { %940 = vmatmul.bf16.gmra.mxu2 %v1341_v52  ;;  %1013 = vmatmul.bf16.gmra.mxu3 %v1345_v53 }
 0x121   : > { %v901_v55 = vpop.f32.mrf.mxu2  ;;  %v974_v56 = vpop.f32.mrf.mxu3 }
 0x122   : > { %v975_v57 = vadd.f32 %v974_v56, %v901_v55  ;;  %v550_v58 = vpop.f32.mrf.mxu0  ;;  %v623_v59 = vpop.f32.mrf.mxu1 }
 0x123   : > { %v624_v61 = vadd.f32 %v623_v59, %v550_v58 }
 0x124   : > { %1054 = vst [vmem:[%s1883_s8 + $0xf8] sm:$0xff] %v975_v57 }
 0x125   : > { %1030 = vst [vmem:[%s1883_s8 + $0x38] sm:$0xff] %v624_v61 }
 0x129   : > { %v903_v3 = vpop.f32.mrf.mxu2  ;;  %v976_v4 = vpop.f32.mrf.mxu3 }
 0x12a   : > { %v977_v7 = vadd.f32 %v976_v4, %v903_v3  ;;  %v553_v8 = vpop.f32.mrf.mxu0  ;;  %v626_v9 = vpop.f32.mrf.mxu1 }
 0x12b   : > { %v627_v12 = vadd.f32 %v626_v9, %v553_v8 }
 0x12c   : > { %1055 = vst [vmem:[%s1883_s8 + $0x100] sm:$0xff] %v977_v7 }
 0x12d   : > { %1031 = vst [vmem:[%s1883_s8 + $0x40] sm:$0xff] %v627_v12  ;;  %592 = vmatmul.bf16.gmra.mxu0 %v416_v5  ;;  %665 = vmatmul.bf16.gmra.mxu1 %v417_v6 }
 0x12e   : > { %945 = vmatmul.bf16.gmra.mxu2 %v769_v10  ;;  %1018 = vmatmul.bf16.gmra.mxu3 %v770_v11 }
 0x131   : > { %v906_v13 = vpop.f32.mrf.mxu2  ;;  %v979_v14 = vpop.f32.mrf.mxu3 }
 0x132   : > { %v980_v15 = vadd.f32 %v979_v14, %v906_v13  ;;  %v555_v16 = vpop.f32.mrf.mxu0  ;;  %v628_v17 = vpop.f32.mrf.mxu1 }
 0x133   : > { %v629_v18 = vadd.f32 %v628_v17, %v555_v16 }
 0x134   : > { %1056 = vst [vmem:[%s1883_s8 + $0x108] sm:$0xff] %v980_v15 }
 0x135   : > { %1032 = vst [vmem:[%s1883_s8 + $0x48] sm:$0xff] %v629_v18 }
 0x139   : > { %v908_v19 = vpop.f32.mrf.mxu2  ;;  %v981_v20 = vpop.f32.mrf.mxu3 }
 0x13a   : > { %v982_v21 = vadd.f32 %v981_v20, %v908_v19  ;;  %v558_v22 = vpop.f32.mrf.mxu0  ;;  %v631_v23 = vpop.f32.mrf.mxu1 }
 0x13b   : > { %v632_v24 = vadd.f32 %v631_v23, %v558_v22 }
 0x13c   : > { %1057 = vst [vmem:[%s1883_s8 + $0x110] sm:$0xff] %v982_v21 }
 0x13d   : > { %1033 = vst [vmem:[%s1883_s8 + $0x50] sm:$0xff] %v632_v24 }
 0x141   : > { %v911_v25 = vpop.f32.mrf.mxu2  ;;  %v984_v26 = vpop.f32.mrf.mxu3 }
 0x142   : > { %v985_v27 = vadd.f32 %v984_v26, %v911_v25  ;;  %v560_v28 = vpop.f32.mrf.mxu0  ;;  %v633_v29 = vpop.f32.mrf.mxu1 }
 0x143   : > { %v634_v30 = vadd.f32 %v633_v29, %v560_v28 }
 0x144   : > { %1058 = vst [vmem:[%s1883_s8 + $0x118] sm:$0xff] %v985_v27 }
 0x145   : > { %1034 = vst [vmem:[%s1883_s8 + $0x58] sm:$0xff] %v634_v30 }
 0x149   : > { %v913_v31 = vpop.f32.mrf.mxu2  ;;  %v986_v32 = vpop.f32.mrf.mxu3 }
 0x14a   : > { %v987_v33 = vadd.f32 %v986_v32, %v913_v31  ;;  %v563_v34 = vpop.f32.mrf.mxu0  ;;  %v636_v35 = vpop.f32.mrf.mxu1 }
 0x14b   : > { %v637_v36 = vadd.f32 %v636_v35, %v563_v34 }
 0x14c   : > { %1059 = vst [vmem:[%s1883_s8 + $0x120] sm:$0xff] %v987_v33 }
 0x14d   : > { %1035 = vst [vmem:[%s1883_s8 + $0x60] sm:$0xff] %v637_v36 }
 0x151   : > { %v916_v37 = vpop.f32.mrf.mxu2  ;;  %v989_v38 = vpop.f32.mrf.mxu3 }
 0x152   : > { %v990_v39 = vadd.f32 %v989_v38, %v916_v37  ;;  %v565_v40 = vpop.f32.mrf.mxu0  ;;  %v638_v41 = vpop.f32.mrf.mxu1 }
 0x153   : > { %v639_v42 = vadd.f32 %v638_v41, %v565_v40 }
 0x154   : > { %1060 = vst [vmem:[%s1883_s8 + $0x128] sm:$0xff] %v990_v39 }
 0x155   : > { %1036 = vst [vmem:[%s1883_s8 + $0x68] sm:$0xff] %v639_v42 }
 0x159   : > { %v918_v43 = vpop.f32.mrf.mxu2  ;;  %v991_v44 = vpop.f32.mrf.mxu3 }
 0x15a   : > { %v992_v45 = vadd.f32 %v991_v44, %v918_v43  ;;  %v568_v46 = vpop.f32.mrf.mxu0  ;;  %v641_v47 = vpop.f32.mrf.mxu1 }
 0x15b   : > { %v642_v48 = vadd.f32 %v641_v47, %v568_v46 }
 0x15c   : > { %1061 = vst [vmem:[%s1883_s8 + $0x130] sm:$0xff] %v992_v45 }
 0x15d   : > { %1037 = vst [vmem:[%s1883_s8 + $0x70] sm:$0xff] %v642_v48 }
 0x161   : > { %v921_v49 = vpop.f32.mrf.mxu2  ;;  %v994_v50 = vpop.f32.mrf.mxu3 }
 0x162   : > { %v995_v51 = vadd.f32 %v994_v50, %v921_v49  ;;  %v570_v52 = vpop.f32.mrf.mxu0  ;;  %v643_v53 = vpop.f32.mrf.mxu1 }
 0x163   : > { %v644_v54 = vadd.f32 %v643_v53, %v570_v52 }
 0x164   : > { %1062 = vst [vmem:[%s1883_s8 + $0x138] sm:$0xff] %v995_v51 }
 0x165   : > { %1038 = vst [vmem:[%s1883_s8 + $0x78] sm:$0xff] %v644_v54 }
 0x169   : > { %v923_v55 = vpop.f32.mrf.mxu2  ;;  %v996_v56 = vpop.f32.mrf.mxu3 }
 0x16a   : > { %v997_v57 = vadd.f32 %v996_v56, %v923_v55  ;;  %v573_v58 = vpop.f32.mrf.mxu0  ;;  %v646_v59 = vpop.f32.mrf.mxu1 }
 0x16b   : > { %v647_v60 = vadd.f32 %v646_v59, %v573_v58 }
 0x16c   : > { %1063 = vst [vmem:[%s1883_s8 + $0x140] sm:$0xff] %v997_v57 }
 0x16d   : > { %1039 = vst [vmem:[%s1883_s8 + $0x80] sm:$0xff] %v647_v60 }
 0x171   : > { %v926_v61 = vpop.f32.mrf.mxu2  ;;  %v999_v62 = vpop.f32.mrf.mxu3 }
 0x172   : > { %v1000_v63 = vadd.f32 %v999_v62, %v926_v61  ;;  %v575_v0 = vpop.f32.mrf.mxu0  ;;  %v648_v1 = vpop.f32.mrf.mxu1 }
 0x173   : > { %v649_v2 = vadd.f32 %v648_v1, %v575_v0 }
 0x174   : > { %1064 = vst [vmem:[%s1883_s8 + $0x148] sm:$0xff] %v1000_v63 }
 0x175   : > { %1040 = vst [vmem:[%s1883_s8 + $0x88] sm:$0xff] %v649_v2 }
 0x179   : > { %v928_v3 = vpop.f32.mrf.mxu2  ;;  %v1001_v4 = vpop.f32.mrf.mxu3 }
 0x17a   : > { %v1002_v5 = vadd.f32 %v1001_v4, %v928_v3  ;;  %v578_v6 = vpop.f32.mrf.mxu0  ;;  %v651_v7 = vpop.f32.mrf.mxu1 }
 0x17b   : > { %v652_v8 = vadd.f32 %v651_v7, %v578_v6 }
 0x17c   : > { %1065 = vst [vmem:[%s1883_s8 + $0x150] sm:$0xff] %v1002_v5 }
 0x17d   : > { %1041 = vst [vmem:[%s1883_s8 + $0x90] sm:$0xff] %v652_v8 }
 0x181   : > { %v931_v9 = vpop.f32.mrf.mxu2  ;;  %v1004_v10 = vpop.f32.mrf.mxu3 }
 0x182   : > { %v1005_v11 = vadd.f32 %v1004_v10, %v931_v9  ;;  %v580_v12 = vpop.f32.mrf.mxu0  ;;  %v653_v13 = vpop.f32.mrf.mxu1 }
 0x183   : > { %v654_v14 = vadd.f32 %v653_v13, %v580_v12 }
 0x184   : > { %1066 = vst [vmem:[%s1883_s8 + $0x158] sm:$0xff] %v1005_v11 }
 0x185   : > { %1042 = vst [vmem:[%s1883_s8 + $0x98] sm:$0xff] %v654_v14 }
 0x189   : > { %v933_v15 = vpop.f32.mrf.mxu2  ;;  %v1006_v16 = vpop.f32.mrf.mxu3 }
 0x18a   : > { %v1007_v17 = vadd.f32 %v1006_v16, %v933_v15  ;;  %v583_v18 = vpop.f32.mrf.mxu0  ;;  %v656_v19 = vpop.f32.mrf.mxu1 }
 0x18b   : > { %v657_v20 = vadd.f32 %v656_v19, %v583_v18 }
 0x18c   : > { %1067 = vst [vmem:[%s1883_s8 + $0x160] sm:$0xff] %v1007_v17 }
 0x18d   : > { %1043 = vst [vmem:[%s1883_s8 + $0xa0] sm:$0xff] %v657_v20 }
 0x191   : > { %v936_v21 = vpop.f32.mrf.mxu2  ;;  %v1009_v22 = vpop.f32.mrf.mxu3 }
 0x192   : > { %v1010_v23 = vadd.f32 %v1009_v22, %v936_v21  ;;  %v585_v24 = vpop.f32.mrf.mxu0  ;;  %v658_v25 = vpop.f32.mrf.mxu1 }
 0x193   : > { %v659_v26 = vadd.f32 %v658_v25, %v585_v24 }
 0x194   : > { %1068 = vst [vmem:[%s1883_s8 + $0x168] sm:$0xff] %v1010_v23 }
 0x195   : > { %1044 = vst [vmem:[%s1883_s8 + $0xa8] sm:$0xff] %v659_v26 }
 0x199   : > { %v938_v27 = vpop.f32.mrf.mxu2  ;;  %v1011_v28 = vpop.f32.mrf.mxu3 }
 0x19a   : > { %v1012_v29 = vadd.f32 %v1011_v28, %v938_v27  ;;  %v588_v30 = vpop.f32.mrf.mxu0  ;;  %v661_v31 = vpop.f32.mrf.mxu1 }
 0x19b   : > { %v662_v32 = vadd.f32 %v661_v31, %v588_v30 }
 0x19c   : > { %1069 = vst [vmem:[%s1883_s8 + $0x170] sm:$0xff] %v1012_v29 }
 0x19d   : > { %1045 = vst [vmem:[%s1883_s8 + $0xb0] sm:$0xff] %v662_v32 }
 0x1a1   : > { %v941_v33 = vpop.f32.mrf.mxu2  ;;  %v1014_v34 = vpop.f32.mrf.mxu3 }
 0x1a2   : > { %v1015_v35 = vadd.f32 %v1014_v34, %v941_v33  ;;  %v590_v36 = vpop.f32.mrf.mxu0  ;;  %v663_v37 = vpop.f32.mrf.mxu1 }
 0x1a3   : > { %v664_v38 = vadd.f32 %v663_v37, %v590_v36 }
 0x1a4   : > { %1070 = vst [vmem:[%s1883_s8 + $0x178] sm:$0xff] %v1015_v35 }
 0x1a5   : > { %1046 = vst [vmem:[%s1883_s8 + $0xb8] sm:$0xff] %v664_v38 }
 0x1a9   : > { %v943_v39 = vpop.f32.mrf.mxu2  ;;  %v1016_v40 = vpop.f32.mrf.mxu3 }
 0x1aa   : > { %v1017_v41 = vadd.f32 %v1016_v40, %v943_v39  ;;  %v593_v42 = vpop.f32.mrf.mxu0  ;;  %v666_v43 = vpop.f32.mrf.mxu1 }
 0x1ab   : > { %v667_v44 = vadd.f32 %v666_v43, %v593_v42 }
 0x1ac   : > { %1071 = vst [vmem:[%s1883_s8 + $0x180] sm:$0xff] %v1017_v41 }
 0x1ad   : > { %1047 = vst [vmem:[%s1883_s8 + $0xc0] sm:$0xf] %v667_v44 }
 0x1b1   : > { %v946_v45 = vpop.f32.mrf.mxu2  ;;  %v1019_v46 = vpop.f32.mrf.mxu3 }
 0x1b2   : > { %v1020_v47 = vadd.f32 %v1019_v46, %v946_v45  ;;  %v595_v48 = vpop.f32.mrf.mxu0  ;;  %v668_v49 = vpop.f32.mrf.mxu1 }
 0x1b4   : > { %1072 = vst [vmem:[%s1883_s8 + $0x188] sm:$0xf] %v1020_v47 }
 0x1b9   : > { %v948_v50 = vpop.f32.mrf.mxu2  ;;  %v1021_v51 = vpop.f32.mrf.mxu3 }
 0x1ba PF: > { %p12_p7 = scmp.ge.s32.totalorder %s1543_s14, 4   ;;  %s2032_s9 = smov %s1496_s10 }
 0x1bb   : > { %s2033_s10 = smov %s1500_s11  ;;  %s2034_s11 = smov %s1553_s17 }
 0x1bc   : > { %s2035_s12 = smov %s1543_s14  ;;  %14 = sbr.rel (!%p12_p7) target bundleno = 3 (0x3), region = 68 }
 0x1c1   :  { %1097 = vsyncpa [#allocation3], 1 }
 0x1c2   :  { %1099 = vsyncpa [#allocation3 + $0x1], 1 }

</bundles_post_ra>
